<compile_context>
chip_gen: v7x
topology: tpu7x:2x2x1
jax: 0.10.0
libtpu: 0.0.40
codegen_flags: <defaults>
</compile_context>

<pallas_src>
import functools

import jax
import jax.numpy as jnp
from jax import lax
from jax.experimental import pallas as pl
from jax.experimental.pallas import tpu as pltpu


# ---------------------------------------------------------------------------
# Kernels
# ---------------------------------------------------------------------------

def _vmem_table_kernel(ids_ref, table_ref, out_ref):
    """Gather one (TILE, E) block from a VMEM-resident table (one-hot matmul)."""
    ids = ids_ref[...]                                    # (TILE, 1) int32
    tile = out_ref.shape[0]
    v = table_ref.shape[0]
    col = lax.broadcasted_iota(jnp.int32, (tile, v), 1)
    onehot = (ids == col).astype(table_ref.dtype)         # OOV (-1) -> all-zero row
    rows = jnp.dot(onehot, table_ref[...], preferred_element_type=jnp.float32)
    # NaN-safe zeroing of OOV / padding rows, one batched store of the block.
    out_ref[...] = jnp.where(ids >= 0, rows, 0.0).astype(out_ref.dtype)


def _hbm_gather_kernel(ids_smem, idcol_ref, table_hbm, out_ref, rows, sem, *,
                       tile):
    """Gather TILE data-dependent rows from the HBM table with concurrent DMAs."""
    base = pl.program_id(0) * tile
    # Issue all row gathers up front so their latencies overlap.  HBM DMAs are
    # not bounds-checked, so OOV ids (-1) are clamped to row 0 here and masked
    # out below.
    for j in range(tile):
        idx = jnp.maximum(ids_smem[base + j], 0)
        pltpu.make_async_copy(table_hbm.at[idx], rows.at[j], sem.at[0]).start()
    # Every copy has identical shape, so `tile` waits on the shared semaphore
    # block until all rows have landed.
    for j in range(tile):
        pltpu.make_async_copy(table_hbm.at[0], rows.at[j], sem.at[0]).wait()
    valid = idcol_ref[...] >= 0                           # (TILE, 1) bool
    # One batched, NaN-safe masked store of the whole (TILE, E) block.
    out_ref[...] = jnp.where(valid, rows[...], 0.0).astype(out_ref.dtype)


# ---------------------------------------------------------------------------
# Wrapper
# ---------------------------------------------------------------------------

# Table-resident fast-path cutoffs.  Kept well under every generation's scoped
# VMEM default (v5e/v6e: 128 MiB physical, v7x: only 64 MiB physical) and small
# enough that the (TILE, V) one-hot matmul stays negligible.
_VMEM_TABLE_MAX_BYTES = 2 * 1024 * 1024
_VMEM_TABLE_MAX_ROWS = 4096


@functools.partial(jax.jit, static_argnames=("tile", "vmem_table"))
def atomic_embed(ids, table, *, tile=64, vmem_table=None):
    """ids: int32 [S] (OOV/padding = -1, S % tile == 0); table: f32 [V, E]."""
    (S,) = ids.shape
    V, E = table.shape
    if S % tile:
        raise ValueError("pad ids to a multiple of `tile` (pad value -1)")
    n_tiles = S // tile
    if vmem_table is None:
        vmem_table = (V * E * table.dtype.itemsize <= _VMEM_TABLE_MAX_BYTES
                      and V <= _VMEM_TABLE_MAX_ROWS)
    ids_col = ids.reshape(S, 1)                           # (S, 1) validity column

    if vmem_table:
        # Fast path: whole table resident in VMEM (constant block index ->
        # DMA'd once), MXU one-hot gather, lane/sublane-dense block stores.
        return pl.pallas_call(
            _vmem_table_kernel,
            out_shape=jax.ShapeDtypeStruct((S, E), table.dtype),
            grid=(n_tiles,),
            in_specs=[pl.BlockSpec((tile, 1), lambda i: (i, 0)),
                      pl.BlockSpec((V, E), lambda i: (0, 0))],
            out_specs=pl.BlockSpec((tile, E), lambda i: (i, 0)),
            compiler_params=pltpu.CompilerParams(
                dimension_semantics=("parallel",)),
            cost_estimate=pl.CostEstimate(
                flops=2 * S * V * E, transcendentals=0,
                bytes_accessed=V * E * 4 + 2 * S * E * 4 + S * 4),
        )(ids_col, table)

    # General path: table stays in HBM; manual per-row gather DMAs, one whole
    # word tile per grid step.
    return pl.pallas_call(
        functools.partial(_hbm_gather_kernel, tile=tile),
        out_shape=jax.ShapeDtypeStruct((S, E), table.dtype),
        grid_spec=pltpu.PrefetchScalarGridSpec(
            num_scalar_prefetch=1,                        # ids land in SMEM
            grid=(n_tiles,),
            in_specs=[pl.BlockSpec((tile, 1), lambda i, ids_s: (i, 0)),
                      pl.BlockSpec(memory_space=pl.ANY)],  # raw HBM table
            out_specs=pl.BlockSpec((tile, E), lambda i, ids_s: (i, 0)),
            scratch_shapes=[pltpu.VMEM((tile, E), table.dtype),
                            pltpu.SemaphoreType.DMA((1,))]),
        compiler_params=pltpu.CompilerParams(
            dimension_semantics=("parallel",)),
        cost_estimate=pl.CostEstimate(
            flops=S * E, transcendentals=0,
            bytes_accessed=2 * S * E * 4 + 2 * S * 4),
    )(ids, ids_col, table)


# ---------------------------------------------------------------------------
# Module port
# ---------------------------------------------------------------------------

class AtomicEmbedder:
    """JAX/Pallas port of the PyTorch AtomicEmbedder."""

    _TILE = 64  # words per grid step / output block (8-sublane aligned)

    def __init__(self, vocab, emb_size, case_insensitive=False, key=None):
        self.case_insensitive = case_insensitive
        words = sorted({self.preprocess(w) for w in vocab})
        self.word_to_id = {w: i for i, w in enumerate(words)}
        if key is None:
            key = jax.random.PRNGKey(0)
        v = len(words)
        v_pad = max(8, ((v + 7) // 8) * 8)  # sublane-aligned row count
        tbl = jax.random.normal(key, (v, emb_size), dtype=jnp.float32)
        if v_pad != v:
            tbl = jnp.concatenate(
                [tbl, jnp.zeros((v_pad - v, emb_size), jnp.float32)], axis=0)
        # nn.Embedding weight analogue; padding rows are never selected.
        # TODO(synk): gradient tracking (requires_grad) is handled by the
        # surrounding JAX training loop, not inside the kernel.
        self.table = tbl

    def preprocess(self, word):
        return word.lower() if self.case_insensitive else word

    def _ids(self, words):
        return [self.word_to_id.get(self.preprocess(w), -1) for w in words]

    def forward(self, word):
        return self.forwards([word])[0]

    __call__ = forward

    def forwards(self, words):
        words = list(words)
        n = len(words)
        ids = self._ids(words)
        # Bucket padded length to power-of-2 tile counts so varying sentence
        # lengths reuse a handful of compiled kernels.
        tiles = pl.next_power_of_2(max(1, pl.cdiv(n, self._TILE)))
        s_pad = tiles * self._TILE
        ids_arr = jnp.array(ids + [-1] * (s_pad - n), dtype=jnp.int32)
        out = atomic_embed(ids_arr, self.table, tile=self._TILE)
        return out[:n]

    def embedding_size(self):
        return self.table.shape[1]


# ---------------------------------------------------------------------------
# Demo / correctness check
# ---------------------------------------------------------------------------

if __name__ == "__main__":
    key = jax.random.PRNGKey(0)

    vocab = {"cat", "cats", "Cat", "dog-like", "The", "quick", "fox"}
    emb_size = 32
    emb = AtomicEmbedder(vocab, emb_size=emb_size, case_insensitive=True,
                         key=key)

    # Sequence of 8 words, including case variants and an OOV word ("dog").
    words = ["cat", "Cat", "cats", "dog", "The", "quick", "fox", "CATS"]
    out = jax.block_until_ready(emb.forwards(words))

    # Pure-JAX reference.
    ids_py = [emb.word_to_id.get(emb.preprocess(w), -1) for w in words]
    ids = jnp.array(ids_py, dtype=jnp.int32)
    ref = jnp.where((ids >= 0)[:, None],
                    jnp.take(emb.table, jnp.maximum(ids, 0), axis=0),
                    0.0)

    assert out.shape == (len(words), emb_size)
    assert out.dtype == jnp.float32
    assert jnp.allclose(out, ref), "embedder output does not match reference"
    # case-insensitive: "cat" == "Cat", "cats" == "CATS"
    assert jnp.all(out[0] == out[1])
    assert jnp.all(out[2] == out[7])
    # OOV word "dog" embeds to zeros
    assert jnp.all(out[3] == 0.0)

    # Explicitly exercise BOTH kernel paths on the same padded id vector.
    tile = AtomicEmbedder._TILE
    ids_pad = jnp.array(ids_py + [-1] * (tile - len(ids_py)), dtype=jnp.int32)
    out_vmem = jax.block_until_ready(
        atomic_embed(ids_pad, emb.table, tile=tile, vmem_table=True))
    out_dma = jax.block_until_ready(
        atomic_embed(ids_pad, emb.table, tile=tile, vmem_table=False))
    assert jnp.allclose(out_vmem[:len(words)], ref), "VMEM-table path mismatch"
    assert jnp.allclose(out_dma[:len(words)], ref), "HBM-gather path mismatch"
    assert jnp.all(out_vmem[len(words):] == 0.0)
    assert jnp.all(out_dma[len(words):] == 0.0)

    # single-word forward matches the stacked path
    single = jax.block_until_ready(emb("cat"))
    assert jnp.all(single == out[0])

    # non-tile-multiple length exercises the -1 padding / bucketing path
    odd = jax.block_until_ready(emb.forwards(["fox", "dog", "cat"]))
    assert odd.shape == (3, emb_size)
    assert jnp.all(odd[1] == 0.0)
    assert jnp.allclose(odd[2], out[0])

    print("KERNEL_OK")
</pallas_src>

<mosaic_0001>
module attributes {stable_mosaic.version = 11 : i64} {
  func.func @_vmem_table_kernel(%arg0: i32, %arg1: memref<64x1xi32, #tpu.memory_space<vmem>>, %arg2: memref<8x32xf32, #tpu.memory_space<vmem>>, %arg3: memref<64x32xf32, #tpu.memory_space<vmem>>) attributes {dimension_semantics = [#tpu.dimension_semantics<parallel>], iteration_bounds = array<i64: 1>, scalar_prefetch = 0 : i64, scratch_operands = 0 : i64, tpu.core_type = #tpu.core_type<tc>, window_params = [{transform_indices = @transform_0, window_bounds = array<i64: 64, 1>}, {pipeline_mode = #tpu.pipeline_mode<synchronous>, transform_indices = @transform_1, window_bounds = array<i64: 8, 32>}, {transform_indices = @transform_2, window_bounds = array<i64: 64, 32>}]} {
    %c0 = arith.constant 0 : index
    %c0_0 = arith.constant 0 : index
    %0 = vector.load %arg1[%c0, %c0_0] : memref<64x1xi32, #tpu.memory_space<vmem>>, vector<64x1xi32>
    %1 = tpu.iota {dimensions = array<i32: 1>} : vector<64x8xi32>
    %2 = vector.broadcast %0 : vector<64x1xi32> to vector<64x8xi32>
    %3 = arith.cmpi eq, %2, %1 : vector<64x8xi32>
    %4 = arith.extui %3 : vector<64x8xi1> to vector<64x8xi32>
    %5 = arith.sitofp %4 : vector<64x8xi32> to vector<64x8xf32>
    %c0_1 = arith.constant 0 : index
    %c0_2 = arith.constant 0 : index
    %6 = vector.load %arg2[%c0_1, %c0_2] : memref<8x32xf32, #tpu.memory_space<vmem>>, vector<8x32xf32>
    %cst = arith.constant dense<0.000000e+00> : vector<64x32xf32>
    %7 = tpu.matmul %5, %6, %cst {dimension_numbers = #tpu.dot_dimension_numbers<[1], [0], [0], [1], [0, 0, 1, 1], [], []>} : vector<64x8xf32>, vector<8x32xf32>, vector<64x32xf32> -> vector<64x32xf32>
    %c0_i32 = arith.constant 0 : i32
    %8 = vector.broadcast %c0_i32 : i32 to vector<64x1xi32>
    %9 = arith.cmpi sge, %0, %8 : vector<64x1xi32>
    %cst_3 = arith.constant 0.000000e+00 : f32
    %10 = vector.shape_cast %9 : vector<64x1xi1> to vector<64x1xi1>
    %11 = vector.broadcast %10 : vector<64x1xi1> to vector<64x32xi1>
    %12 = vector.broadcast %cst_3 : f32 to vector<64x32xf32>
    %13 = arith.select %11, %7, %12 : vector<64x32xi1>, vector<64x32xf32>
    %c0_4 = arith.constant 0 : index
    %c0_5 = arith.constant 0 : index
    %14 = vector.load %arg3[%c0_4, %c0_5] : memref<64x32xf32, #tpu.memory_space<vmem>>, vector<64x32xf32>
    tpu.vector_store %arg3[%c0_4, %c0_5], %13 {strides = array<i32>} : memref<64x32xf32, #tpu.memory_space<vmem>>, vector<64x32xf32>,
    return
  }
  func.func @transform_0(%arg0: i32) -> (i32, i32) {
    %c0_i32 = arith.constant 0 : i32
    %c0_i32_0 = arith.constant 0 : i32
    return %arg0, %c0_i32 : i32, i32
  }
  func.func @transform_1(%arg0: i32) -> (i32, i32) {
    %c0_i32 = arith.constant 0 : i32
    %c0_i32_0 = arith.constant 0 : i32
    %c0_i32_1 = arith.constant 0 : i32
    return %c0_i32, %c0_i32_0 : i32, i32
  }
  func.func @transform_2(%arg0: i32) -> (i32, i32) {
    %c0_i32 = arith.constant 0 : i32
    %c0_i32_0 = arith.constant 0 : i32
    return %arg0, %c0_i32 : i32, i32
  }
}

</mosaic_0001>

<bundles_post_ra>
// kernel: atomic_embed.1
= control target key start
LH: loop header
LB: loop body
LE: loop exit
PB: predicated region body
PF: predicated region fallthrough
CT: control target
= control target key end

     0   :  { %v314_v0 = vmov 0   ;;  %v19_v18 = vlaneseq  ;;  %vm70_vm8 = vcmask 64512   ;;  %v315_v22 = vmov 0.0   ;;  %s398_s0 = inlined_call_operand.vmem [shape: s32[64,1], index: 0, kind: input, shape index: {}]   ;;  %s399_s1 = inlined_call_operand.vmem [shape: f32[8,32], index: 1, kind: input, shape index: {}]   ;;  %s400_s2 = inlined_call_operand.vmem [shape: f32[64,32], index: 2, kind: output, shape index: {}]  }
   0x1   :  { %313 = vset.pattern.permute.xlu1 %v314_v0  ;;  %312 = vset.pattern.permute.xlu0 %v314_v0  ;;  %v12_v1 = vld [vmem:[%s398_s0 + $0x8] sm:$0xff]  ;;  %v11_v2 = vld [vmem:[%s398_s0] sm:$0xff]  ;;  %v17_v6 = vld [vmem:[%s398_s0 + $0x30] sm:$0xff] }
   0x2   :  { %25 = vperm.xlu1 %313, %v12_v1   ;;  %22 = vperm.xlu0 %312, %v11_v2   ;;  %v16_v3 = vld [vmem:[%s398_s0 + $0x28] sm:$0xff]  ;;  %v15_v4 = vld [vmem:[%s398_s0 + $0x20] sm:$0xff]  ;;  %v13_v7 = vld [vmem:[%s398_s0 + $0x10] sm:$0xff]  ;;  %vm201_vm0 = vcmp.ge.s32.totalorder %v12_v1, 0  ;;  %vm200_vm1 = vcmp.ge.s32.totalorder %v11_v2, 0  ;;  %vm206_vm7 = vcmp.ge.s32.totalorder %v17_v6, 0 }
   0x3   :  { %v69_v5 = vld [vmem:[%s399_s1] sm:$0xff]  ;;  %v18_v8 = vld [vmem:[%s398_s0 + $0x38] sm:$0xff]  ;;  %v209_v10 = vsel %vm201_vm0, 1, %v314_v0  ;;  %v208_v11 = vsel %vm200_vm1, 1, %v314_v0  ;;  %vm202_vm3 = vcmp.ge.s32.totalorder %v13_v7, 0  ;;  %vm205_vm4 = vcmp.ge.s32.totalorder %v16_v3, 0 }
   0x4   :  { %294 = vmatprep.subr.mxu0 %v69_v5  ;;  %308 = vmatprep.subr.mxu1 %v69_v5  ;;  %v14_v9 = vld [vmem:[%s398_s0 + $0x18] sm:$0xff]  ;;  %v210_v13 = vsel %vm202_vm3, 1, %v314_v0  ;;  %vm204_vm5 = vcmp.ge.s32.totalorder %v15_v4, 0  ;;  %v213_v14 = vsel %vm205_vm4, 1, %v314_v0  ;;  %vm207_vm6 = vcmp.ge.s32.totalorder %v18_v8, 0 }
   0x5   :  { %295 = vmatpush3.msra.mxu0 %v69_v5  ;;  %309 = vmatpush3.msra.mxu1 %v69_v5  ;;  %vm203_vm2 = vcmp.ge.s32.totalorder %v14_v9, 0  ;;  %v212_v15 = vsel %vm204_vm5, 1, %v314_v0  ;;  %v215_v16 = vsel %vm207_vm6, 1, %v314_v0  ;;  %v214_v17 = vsel %vm206_vm7, 1, %v314_v0 }
   0x6   :  { %37 = vperm.xlu1 %313, %v16_v3   ;;  %34 = vperm.xlu0 %312, %v15_v4   ;;  %v211_v12 = vsel %vm203_vm2, 1, %v314_v0  ;;  %v20_v19 = vand.u32 127, %v19_v18  ;;  %vm256_vm1 = vcmask 261120  }
   0xa   :  { %40 = vperm.xlu1 %313, %v17_v6   ;;  %28 = vperm.xlu0 %312, %v13_v7  }
   0xe   :  { %43 = vperm.xlu1 %313, %v18_v8   ;;  %31 = vperm.xlu0 %312, %v14_v9  }
  0x12   :  { %220 = vperm.xlu1 %313, %v209_v10   ;;  %217 = vperm.xlu0 %312, %v208_v11  }
  0x16   :  { %226 = vperm.xlu1 %313, %v211_v12   ;;  %223 = vperm.xlu0 %312, %v210_v13  }
  0x1a   :  { %232 = vperm.xlu1 %313, %v213_v14   ;;  %229 = vperm.xlu0 %312, %v212_v15  }
  0x1e   :  { %238 = vperm.xlu1 %313, %v215_v16   ;;  %235 = vperm.xlu0 %312, %v214_v17  }
  0x81   :  { %v26_v20 = vpop.permute.xlu1 %25  ;;  %v23_v21 = vpop.permute.xlu0 %22 }
  0x82   :  { %vm46_vm9 = vcmp.eq.s32.totalorder %v26_v20, %v20_v19  ;;  %vm45_vm10 = vcmp.eq.s32.totalorder %v23_v21, %v20_v19 }
  0x83   :  { %v270_v23 = vsel %vm46_vm9, 1.0, %v315_v22  ;;  %v269_v24 = vsel %vm45_vm10, 1.0, %v315_v22 }
  0x84   :  { %296 = vmatprep.mubr.msk.f32.mxu0 %vm70_vm8, %v269_v24 }
  0x85   :  { %v38_v25 = vpop.permute.xlu1 %37  ;;  %297 = vmatmul.mubr.msk.f32.vlgmr.msra.gmra.mrb[0].mxu0 %vm70_vm8, %v270_v23  ;;  %v35_v26 = vpop.permute.xlu0 %34 }
  0x86   :  { %vm50_vm11 = vcmp.eq.s32.totalorder %v38_v25, %v20_v19  ;;  %vm49_vm12 = vcmp.eq.s32.totalorder %v35_v26, %v20_v19 }
  0x87   :  { %v274_v27 = vsel %vm50_vm11, 1.0, %v315_v22  ;;  %v273_v28 = vsel %vm49_vm12, 1.0, %v315_v22 }
  0x88   :  { %302 = vmatprep.mubr.msk.f32.mxu1 %vm70_vm8, %v273_v28 }
  0x89   :  { %v41_v29 = vpop.permute.xlu1 %40  ;;  %303 = vmatmul.mubr.msk.f32.vlgmr.msra.gmra.mrb[0].mxu1 %vm70_vm8, %v274_v27  ;;  %v29_v30 = vpop.permute.xlu0 %28 }
  0x8a   :  { %vm51_vm13 = vcmp.eq.s32.totalorder %v41_v29, %v20_v19  ;;  %vm47_vm14 = vcmp.eq.s32.totalorder %v29_v30, %v20_v19 }
  0x8b   :  { %v275_v31 = vsel %vm51_vm13, 1.0, %v315_v22  ;;  %v271_v32 = vsel %vm47_vm14, 1.0, %v315_v22 }
  0x8c   :  { %299 = vmatprep.mubr.msk.f32.mxu0 %vm70_vm8, %v271_v32  ;;  %305 = vmatprep.mubr.msk.f32.mxu1 %vm70_vm8, %v275_v31 }
  0x8d   :  { %v44_v33 = vpop.permute.xlu1 %43  ;;  %v32_v34 = vpop.permute.xlu0 %31 }
  0x8e   :  { %vm52_vm15 = vcmp.eq.s32.totalorder %v44_v33, %v20_v19  ;;  %vm48_vm0 = vcmp.eq.s32.totalorder %v32_v34, %v20_v19 }
  0x8f   :  { %v276_v35 = vsel %vm52_vm15, 1.0, %v315_v22  ;;  %v272_v36 = vsel %vm48_vm0, 1.0, %v315_v22 }
  0x90   :  { %300 = vmatmul.mubr.msk.f32.gmra.mrb[2].mxu0 %vm70_vm8, %v272_v36  ;;  %306 = vmatmul.mubr.msk.f32.gmra.mrb[2].mxu1 %vm70_vm8, %v276_v35 }
  0x91   :  { %v221_v37 = vpop.permute.xlu1 %220  ;;  %v218_v38 = vpop.permute.xlu0 %217 }
  0x92   :  { %vm241_vm2 = vcmp.eq.s32.totalorder %v221_v37, 1  ;;  %vm240_vm3 = vcmp.eq.s32.totalorder %v218_v38, 1 }
  0x95   :  { %v227_v39 = vpop.permute.xlu1 %226  ;;  %v224_v40 = vpop.permute.xlu0 %223 }
  0x96   :  { %vm243_vm6 = vcmp.eq.s32.totalorder %v227_v39, 1  ;;  %vm242_vm8 = vcmp.eq.s32.totalorder %v224_v40, 1 }
  0x99   :  { %v233_v42 = vpop.permute.xlu1 %232  ;;  %v230_v45 = vpop.permute.xlu0 %229 }
  0x9a   :  { %vm245_vm4 = vcmp.eq.s32.totalorder %v233_v42, 1  ;;  %vm244_vm5 = vcmp.eq.s32.totalorder %v230_v45, 1 }
  0x9d   :  { %v239_v51 = vpop.permute.xlu1 %238  ;;  %v236_v52 = vpop.permute.xlu0 %235 }
  0x9e   :  { %vm247_vm7 = vcmp.eq.s32.totalorder %v239_v51, 1  ;;  %vm246_vm9 = vcmp.eq.s32.totalorder %v236_v52, 1 }
 0x158   :  { %v298_v41 = vpop.f32.mrb[0].mxu0 }
 0x159   :  { %v249_v43 = vsel %vm241_vm2, %v298_v41, 0.0  ;;  %v161_v44 = vpop.f32.mrb[1].mxu0 }
 0x15a   :  { %258 = vst.msk [vmem:[%s400_s2 + $0x8] sm:$0xff] %vm256_vm1, %v249_v43  ;;  %v248_v46 = vsel %vm240_vm3, %v161_v44, 0.0 }
 0x15b   :  { %257 = vst.msk [vmem:[%s400_s2] sm:$0xff] %vm256_vm1, %v248_v46 }
 0x15c   :  { %v304_v47 = vpop.f32.mrb[0].mxu1 }
 0x15d   :  { %v253_v48 = vsel %vm245_vm4, %v304_v47, 0.0  ;;  %v181_v49 = vpop.f32.mrb[1].mxu1 }
 0x15e   :  { %262 = vst.msk [vmem:[%s400_s2 + $0x28] sm:$0xff] %vm256_vm1, %v253_v48  ;;  %v252_v50 = vsel %vm244_vm5, %v181_v49, 0.0 }
 0x15f   :  { %261 = vst.msk [vmem:[%s400_s2 + $0x20] sm:$0xff] %vm256_vm1, %v252_v50 }
 0x163   :  { %v301_v53 = vpop.f32.mrb[2].mxu0  ;;  %v307_v54 = vpop.f32.mrb[2].mxu1 }
 0x164   :  { %v251_v55 = vsel %vm243_vm6, %v301_v53, 0.0  ;;  %v255_v56 = vsel %vm247_vm7, %v307_v54, 0.0  ;;  %v171_v57 = vpop.f32.mrb[3].mxu0  ;;  %v191_v58 = vpop.f32.mrb[3].mxu1 }
 0x165   :  { %260 = vst.msk [vmem:[%s400_s2 + $0x18] sm:$0xff] %vm256_vm1, %v251_v55  ;;  %264 = vst.msk [vmem:[%s400_s2 + $0x38] sm:$0xff] %vm256_vm1, %v255_v56  ;;  %v250_v59 = vsel %vm242_vm8, %v171_v57, 0.0  ;;  %v254_v60 = vsel %vm246_vm9, %v191_v58, 0.0 }
 0x166   :  { %259 = vst.msk [vmem:[%s400_s2 + $0x10] sm:$0xff] %vm256_vm1, %v250_v59  ;;  %263 = vst.msk [vmem:[%s400_s2 + $0x30] sm:$0xff] %vm256_vm1, %v254_v60 }

</bundles_post_ra>
